<compile_context>
chip_gen: v5e
topology: v5e:2x2
jax: 0.10.0
libtpu: 0.0.40
codegen_flags: <defaults>
</compile_context>

<pallas_src>
import functools

import jax
import jax.numpy as jnp
from jax.experimental import pallas as pl
from jax.experimental.pallas import tpu as pltpu


IN_DIM = 768 + 1280   # 2048, module default
OUT_DIM = 2


# -----------------------------------------------------------------------------
# Kernel
# -----------------------------------------------------------------------------
def _linear_kernel(x_ref, w_ref, b_ref, o_ref):
    # x_ref: (TB, D)   w_ref: (D, O)   b_ref: (1, O)   o_ref: (TB, O)
    acc = jnp.dot(x_ref[...], w_ref[...], preferred_element_type=jnp.float32)
    o_ref[...] = (acc + b_ref[...]).astype(o_ref.dtype)


# -----------------------------------------------------------------------------
# Jitted implementation (all tiling decisions are static)
# -----------------------------------------------------------------------------
@functools.partial(jax.jit, static_argnames=("block_b",))
def _forward_impl(x, weight, bias, *, block_b):
    B, D = x.shape
    O = weight.shape[0]

    # Unpadded parameters.  The transpose touches only 16 KiB — negligible.
    w_t = weight.T               # (D, O) full-array block
    b2d = bias.reshape(1, O)     # (1, O) full-array block

    grid = (pl.cdiv(B, block_b),)

    itemsize = x.dtype.itemsize
    vmem_needed = (
        2 * block_b * D * itemsize      # x tile (double-buffered)
        + 2 * block_b * O * itemsize    # out tile (double-buffered)
        + 2 * D * O * itemsize          # weight (constant block)
        + 2 * O * itemsize              # bias
    )
    vmem_limit = int(min(max(vmem_needed + (4 << 20), 16 << 20), 48 << 20))

    cost = pl.CostEstimate(
        flops=2 * B * D * O,
        transcendentals=0,
        bytes_accessed=itemsize * (B * D + D * O + B * O + O),
    )

    return pl.pallas_call(
        _linear_kernel,
        out_shape=jax.ShapeDtypeStruct((B, O), x.dtype),
        grid=grid,
        in_specs=[
            pl.BlockSpec((block_b, D), lambda i: (i, 0)),   # x row-tile
            pl.BlockSpec((D, O), lambda i: (0, 0)),         # full weight (constant)
            pl.BlockSpec((1, O), lambda i: (0, 0)),         # bias (constant)
        ],
        out_specs=pl.BlockSpec((block_b, O), lambda i: (i, 0)),
        compiler_params=pltpu.CompilerParams(
            dimension_semantics=("parallel",),
            vmem_limit_bytes=vmem_limit,
        ),
        cost_estimate=cost,
    )(x, w_t, b2d)


# -----------------------------------------------------------------------------
# Public wrapper: picks a static batch tile from the shapes + chip generation
# -----------------------------------------------------------------------------
def _round_up(n, m):
    return ((n + m - 1) // m) * m


def _tc_config():
    """Returns (two_tensorcores_per_chip, max_block_rows) for the attached TPU."""
    kind = ""
    try:
        kind = jax.devices()[0].device_kind.lower()
    except Exception:
        pass
    two_cores = any(tag in kind for tag in ("v4", "v5p", "v7"))
    cap = 1024 if "v7" in kind else 512   # v7x: amortize per-step overhead vs 3.2 TB/s HBM
    return two_cores, cap


def video_seg_classification_forward(x, weight, bias):
    """Forward pass of VideoSegClassificationModel.

    x:      [B, in_dim] float32
    weight: [out_dim, in_dim] float32   (PyTorch nn.Linear layout)
    bias:   [out_dim] float32
    returns [B, out_dim] float32
    """
    B, D = x.shape
    O = weight.shape[0]
    assert weight.shape == (O, D)
    assert bias.shape == (O,)

    two_cores, cap = _tc_config()
    b_al = _round_up(B, 8)                      # sublane (8) alignment for the tile
    if b_al <= 128:
        block_b = b_al                          # tiny batch: one grid step everywhere
    elif two_cores:
        # Keep >= 2 grid steps so "parallel" shards across both TensorCores.
        block_b = min(_round_up(-(-b_al // 2), 8), cap)
    else:
        block_b = min(b_al, cap)                # single TC: collapse grid up to the cap

    return _forward_impl(x, weight, bias, block_b=block_b)


# -----------------------------------------------------------------------------
# Deterministic init mimicking nn.Linear's kaiming-uniform defaults
# -----------------------------------------------------------------------------
def init_params(key, in_dim, out_dim):
    k_w, k_b = jax.random.split(key)
    bound = 1.0 / jnp.sqrt(jnp.float32(in_dim))
    weight = jax.random.uniform(
        k_w, (out_dim, in_dim), dtype=jnp.float32, minval=-bound, maxval=bound
    )
    bias = jax.random.uniform(
        k_b, (out_dim,), dtype=jnp.float32, minval=-bound, maxval=bound
    )
    return weight, bias


if __name__ == "__main__":
    key = jax.random.PRNGKey(0)
    k_x, k_p, k_x2 = jax.random.split(key, 3)

    weight, bias = init_params(k_p, IN_DIM, OUT_DIM)

    # Case 1: small 8-aligned batch — single collapsed grid step.
    BATCH = 16
    x = jax.random.normal(k_x, (BATCH, IN_DIM), dtype=jnp.float32)
    out = jax.block_until_ready(video_seg_classification_forward(x, weight, bias))
    ref = x @ weight.T + bias
    assert out.shape == (BATCH, OUT_DIM)
    assert jnp.allclose(out, ref, atol=1e-4, rtol=1e-4), "mismatch vs reference (B=16)"

    # Case 2: ragged batch (not a multiple of 8) — exercises the boundary-block path.
    BATCH2 = 13
    x2 = jax.random.normal(k_x2, (BATCH2, IN_DIM), dtype=jnp.float32)
    out2 = jax.block_until_ready(video_seg_classification_forward(x2, weight, bias))
    ref2 = x2 @ weight.T + bias
    assert out2.shape == (BATCH2, OUT_DIM)
    assert jnp.allclose(out2, ref2, atol=1e-4, rtol=1e-4), "mismatch vs reference (B=13)"

    print("KERNEL_OK")
</pallas_src>

<mosaic_0001>
module attributes {stable_mosaic.version = 11 : i64} {
  func.func @_linear_kernel(%arg0: i32, %arg1: memref<16x2048xf32, #tpu.memory_space<vmem>>, %arg2: memref<2048x2xf32, #tpu.memory_space<vmem>>, %arg3: memref<1x2xf32, #tpu.memory_space<vmem>>, %arg4: memref<16x2xf32, #tpu.memory_space<vmem>>) attributes {dimension_semantics = [#tpu.dimension_semantics<parallel>], iteration_bounds = array<i64: 1>, scalar_prefetch = 0 : i64, scratch_operands = 0 : i64, tpu.core_type = #tpu.core_type<tc>, window_params = [{transform_indices = @transform_0, window_bounds = array<i64: 16, 2048>}, {pipeline_mode = #tpu.pipeline_mode<synchronous>, transform_indices = @transform_1, window_bounds = array<i64: 2048, 2>}, {pipeline_mode = #tpu.pipeline_mode<synchronous>, transform_indices = @transform_2, window_bounds = array<i64: 1, 2>}, {transform_indices = @transform_3, window_bounds = array<i64: 16, 2>}]} {
    %c0 = arith.constant 0 : index
    %c0_0 = arith.constant 0 : index
    %0 = vector.load %arg1[%c0, %c0_0] : memref<16x2048xf32, #tpu.memory_space<vmem>>, vector<16x2048xf32>
    %c0_1 = arith.constant 0 : index
    %c0_2 = arith.constant 0 : index
    %1 = vector.load %arg2[%c0_1, %c0_2] : memref<2048x2xf32, #tpu.memory_space<vmem>>, vector<2048x2xf32>
    %cst = arith.constant dense<0.000000e+00> : vector<16x2xf32>
    %2 = tpu.matmul %0, %1, %cst {dimension_numbers = #tpu.dot_dimension_numbers<[1], [0], [0], [1], [0, 0, 1, 1], [], []>} : vector<16x2048xf32>, vector<2048x2xf32>, vector<16x2xf32> -> vector<16x2xf32>
    %c0_3 = arith.constant 0 : index
    %c0_4 = arith.constant 0 : index
    %3 = vector.load %arg3[%c0_3, %c0_4] : memref<1x2xf32, #tpu.memory_space<vmem>>, vector<1x2xf32>
    %4 = vector.broadcast %3 : vector<1x2xf32> to vector<16x2xf32>
    %5 = arith.addf %2, %4 : vector<16x2xf32>
    %c0_5 = arith.constant 0 : index
    %c0_6 = arith.constant 0 : index
    %6 = vector.load %arg4[%c0_5, %c0_6] : memref<16x2xf32, #tpu.memory_space<vmem>>, vector<16x2xf32>
    tpu.vector_store %arg4[%c0_5, %c0_6], %5 {strides = array<i32>} : memref<16x2xf32, #tpu.memory_space<vmem>>, vector<16x2xf32>,
    return
  }
  func.func @transform_0(%arg0: i32) -> (i32, i32) {
    %c0_i32 = arith.constant 0 : i32
    %c0_i32_0 = arith.constant 0 : i32
    return %arg0, %c0_i32 : i32, i32
  }
  func.func @transform_1(%arg0: i32) -> (i32, i32) {
    %c0_i32 = arith.constant 0 : i32
    %c0_i32_0 = arith.constant 0 : i32
    %c0_i32_1 = arith.constant 0 : i32
    return %c0_i32, %c0_i32_0 : i32, i32
  }
  func.func @transform_2(%arg0: i32) -> (i32, i32) {
    %c0_i32 = arith.constant 0 : i32
    %c0_i32_0 = arith.constant 0 : i32
    %c0_i32_1 = arith.constant 0 : i32
    return %c0_i32, %c0_i32_0 : i32, i32
  }
  func.func @transform_3(%arg0: i32) -> (i32, i32) {
    %c0_i32 = arith.constant 0 : i32
    %c0_i32_0 = arith.constant 0 : i32
    return %arg0, %c0_i32 : i32, i32
  }
}

</mosaic_0001>

<bundles_post_ra>
// kernel: _forward_impl.1
= control target key start
LH: loop header
LB: loop body
LE: loop exit
PB: predicated region body
PF: predicated region fallthrough
CT: control target
= control target key end

     0   :  { %vm674_vm0 = vcmask 15360   ;;  %s1575_s1 = inlined_call_operand.vmem [shape: f32[2048,2], index: 1, kind: input, shape index: {}]   ;;  %s1576_s0 = inlined_call_operand.vmem [shape: f32[16,2048], index: 0, kind: input, shape index: {}]   ;;  %s1577_s2 = inlined_call_operand.vmem [shape: f32[1,2], index: 2, kind: input, shape index: {}]   ;;  %s1578_s3 = inlined_call_operand.vmem [shape: f32[16,2], index: 3, kind: output, shape index: {}]  }
   0x1   :  { %v61_v0 = vld [vmem:[%s1575_s1 + $0x78] sm:$0xff]  ;;  %v60_v2 = vld [vmem:[%s1575_s1 + $0x70] sm:$0xff]  ;;  %v59_v6 = vld [vmem:[%s1575_s1 + $0x68] sm:$0xff] }
   0x2   :  { %v93_v1 = vld [vmem:[%s1575_s1 + $0x178] sm:$0xff]  ;;  %306 = vmatpush.msra.mxu0 %v61_v0  ;;  %v92_v4 = vld [vmem:[%s1575_s1 + $0x170] sm:$0xff]  ;;  %v91_v8 = vld [vmem:[%s1575_s1 + $0x168] sm:$0xff] }
   0x3   :  { %352 = vmatpush.msra.mxu2 %v93_v1  ;;  %v77_v3 = vld [vmem:[%s1575_s1 + $0xf8] sm:$0xff]  ;;  %v76_v7 = vld [vmem:[%s1575_s1 + $0xf0] sm:$0xff]  ;;  %v75_v10 = vld [vmem:[%s1575_s1 + $0xe8] sm:$0xff] }
   0x4   :  { %v109_v5 = vld [vmem:[%s1575_s1 + $0x1f8] sm:$0xff]  ;;  %329 = vmatpush.msra.mxu1 %v77_v3  ;;  %307 = vmatpush.msra.mxu0 %v60_v2  ;;  %v108_v9 = vld [vmem:[%s1575_s1 + $0x1f0] sm:$0xff]  ;;  %v58_v11 = vld [vmem:[%s1575_s1 + $0x60] sm:$0xff] }
   0x5   :  { %375 = vmatpush.msra.mxu3 %v109_v5  ;;  %353 = vmatpush.msra.mxu2 %v92_v4  ;;  %v90_v12 = vld [vmem:[%s1575_s1 + $0x160] sm:$0xff]  ;;  %v107_v13 = vld [vmem:[%s1575_s1 + $0x1e8] sm:$0xff]  ;;  %v57_v16 = vld [vmem:[%s1575_s1 + $0x58] sm:$0xff] }
   0x6   :  { %330 = vmatpush.msra.mxu1 %v76_v7  ;;  %308 = vmatpush.msra.mxu0 %v59_v6  ;;  %v74_v14 = vld [vmem:[%s1575_s1 + $0xe0] sm:$0xff]  ;;  %v89_v17 = vld [vmem:[%s1575_s1 + $0x158] sm:$0xff]  ;;  %v56_v20 = vld [vmem:[%s1575_s1 + $0x50] sm:$0xff] }
   0x7   :  { %376 = vmatpush.msra.mxu3 %v108_v9  ;;  %354 = vmatpush.msra.mxu2 %v91_v8  ;;  %v106_v15 = vld [vmem:[%s1575_s1 + $0x1e0] sm:$0xff]  ;;  %v73_v18 = vld [vmem:[%s1575_s1 + $0xd8] sm:$0xff]  ;;  %v88_v21 = vld [vmem:[%s1575_s1 + $0x150] sm:$0xff] }
   0x8   :  { %331 = vmatpush.msra.mxu1 %v75_v10  ;;  %309 = vmatpush.msra.mxu0 %v58_v11  ;;  %v105_v19 = vld [vmem:[%s1575_s1 + $0x1d8] sm:$0xff]  ;;  %v72_v22 = vld [vmem:[%s1575_s1 + $0xd0] sm:$0xff]  ;;  %v55_v24 = vld [vmem:[%s1575_s1 + $0x48] sm:$0xff] }
   0x9   :  { %377 = vmatpush.msra.mxu3 %v107_v13  ;;  %355 = vmatpush.msra.mxu2 %v90_v12  ;;  %v104_v23 = vld [vmem:[%s1575_s1 + $0x1d0] sm:$0xff]  ;;  %v87_v25 = vld [vmem:[%s1575_s1 + $0x148] sm:$0xff]  ;;  %v54_v28 = vld [vmem:[%s1575_s1 + $0x40] sm:$0xff] }
   0xa   :  { %332 = vmatpush.msra.mxu1 %v74_v14  ;;  %310 = vmatpush.msra.mxu0 %v57_v16  ;;  %v71_v26 = vld [vmem:[%s1575_s1 + $0xc8] sm:$0xff]  ;;  %v86_v29 = vld [vmem:[%s1575_s1 + $0x140] sm:$0xff]  ;;  %v53_v32 = vld [vmem:[%s1575_s1 + $0x38] sm:$0xff] }
   0xb   :  { %378 = vmatpush.msra.mxu3 %v106_v15  ;;  %356 = vmatpush.msra.mxu2 %v89_v17  ;;  %v103_v27 = vld [vmem:[%s1575_s1 + $0x1c8] sm:$0xff]  ;;  %v70_v30 = vld [vmem:[%s1575_s1 + $0xc0] sm:$0xff]  ;;  %v85_v33 = vld [vmem:[%s1575_s1 + $0x138] sm:$0xff] }
   0xc   :  { %333 = vmatpush.msra.mxu1 %v73_v18  ;;  %311 = vmatpush.msra.mxu0 %v56_v20  ;;  %v102_v31 = vld [vmem:[%s1575_s1 + $0x1c0] sm:$0xff]  ;;  %v69_v34 = vld [vmem:[%s1575_s1 + $0xb8] sm:$0xff]  ;;  %v52_v36 = vld [vmem:[%s1575_s1 + $0x30] sm:$0xff] }
   0xd   :  { %379 = vmatpush.msra.mxu3 %v105_v19  ;;  %357 = vmatpush.msra.mxu2 %v88_v21  ;;  %v101_v35 = vld [vmem:[%s1575_s1 + $0x1b8] sm:$0xff]  ;;  %v84_v37 = vld [vmem:[%s1575_s1 + $0x130] sm:$0xff]  ;;  %v51_v40 = vld [vmem:[%s1575_s1 + $0x28] sm:$0xff] }
   0xe   :  { %334 = vmatpush.msra.mxu1 %v72_v22  ;;  %312 = vmatpush.msra.mxu0 %v55_v24  ;;  %v68_v38 = vld [vmem:[%s1575_s1 + $0xb0] sm:$0xff]  ;;  %v83_v41 = vld [vmem:[%s1575_s1 + $0x128] sm:$0xff]  ;;  %v50_v44 = vld [vmem:[%s1575_s1 + $0x20] sm:$0xff] }
   0xf   :  { %380 = vmatpush.msra.mxu3 %v104_v23  ;;  %358 = vmatpush.msra.mxu2 %v87_v25  ;;  %v100_v39 = vld [vmem:[%s1575_s1 + $0x1b0] sm:$0xff]  ;;  %v67_v42 = vld [vmem:[%s1575_s1 + $0xa8] sm:$0xff]  ;;  %v82_v45 = vld [vmem:[%s1575_s1 + $0x120] sm:$0xff] }
  0x10   :  { %335 = vmatpush.msra.mxu1 %v71_v26  ;;  %313 = vmatpush.msra.mxu0 %v54_v28  ;;  %v99_v43 = vld [vmem:[%s1575_s1 + $0x1a8] sm:$0xff]  ;;  %v66_v46 = vld [vmem:[%s1575_s1 + $0xa0] sm:$0xff]  ;;  %v49_v48 = vld [vmem:[%s1575_s1 + $0x18] sm:$0xff] }
  0x11   :  { %381 = vmatpush.msra.mxu3 %v103_v27  ;;  %359 = vmatpush.msra.mxu2 %v86_v29  ;;  %v98_v47 = vld [vmem:[%s1575_s1 + $0x1a0] sm:$0xff]  ;;  %v81_v49 = vld [vmem:[%s1575_s1 + $0x118] sm:$0xff]  ;;  %v48_v52 = vld [vmem:[%s1575_s1 + $0x10] sm:$0xff] }
  0x12   :  { %336 = vmatpush.msra.mxu1 %v70_v30  ;;  %314 = vmatpush.msra.mxu0 %v53_v32  ;;  %v65_v50 = vld [vmem:[%s1575_s1 + $0x98] sm:$0xff]  ;;  %v80_v53 = vld [vmem:[%s1575_s1 + $0x110] sm:$0xff]  ;;  %v47_v56 = vld [vmem:[%s1575_s1 + $0x8] sm:$0xff] }
  0x13   :  { %382 = vmatpush.msra.mxu3 %v102_v31  ;;  %360 = vmatpush.msra.mxu2 %v85_v33  ;;  %v97_v51 = vld [vmem:[%s1575_s1 + $0x198] sm:$0xff]  ;;  %v64_v54 = vld [vmem:[%s1575_s1 + $0x90] sm:$0xff]  ;;  %v79_v57 = vld [vmem:[%s1575_s1 + $0x108] sm:$0xff] }
  0x14   :  { %337 = vmatpush.msra.mxu1 %v69_v34  ;;  %315 = vmatpush.msra.mxu0 %v52_v36  ;;  %v96_v55 = vld [vmem:[%s1575_s1 + $0x190] sm:$0xff]  ;;  %v63_v58 = vld [vmem:[%s1575_s1 + $0x88] sm:$0xff]  ;;  %v46_v60 = vld [vmem:[%s1575_s1] sm:$0xff] }
  0x15   :  { %383 = vmatpush.msra.mxu3 %v101_v35  ;;  %361 = vmatpush.msra.mxu2 %v84_v37  ;;  %v95_v59 = vld [vmem:[%s1575_s1 + $0x188] sm:$0xff]  ;;  %v78_v61 = vld [vmem:[%s1575_s1 + $0x100] sm:$0xff]  ;;  %v125_v62 = vld [vmem:[%s1575_s1 + $0x278] sm:$0xff] }
  0x16   :  { %338 = vmatpush.msra.mxu1 %v68_v38  ;;  %316 = vmatpush.msra.mxu0 %v51_v40  ;;  %v157_v63 = vld [vmem:[%s1575_s1 + $0x378] sm:$0xff]  ;;  %v62_v0 = vld [vmem:[%s1575_s1 + $0x80] sm:$0xff]  ;;  %v124_v2 = vld [vmem:[%s1575_s1 + $0x270] sm:$0xff] }
  0x17   :  { %384 = vmatpush.msra.mxu3 %v100_v39  ;;  %362 = vmatpush.msra.mxu2 %v83_v41  ;;  %v94_v1 = vld [vmem:[%s1575_s1 + $0x180] sm:$0xff]  ;;  %v141_v3 = vld [vmem:[%s1575_s1 + $0x2f8] sm:$0xff]  ;;  %v156_v4 = vld [vmem:[%s1575_s1 + $0x370] sm:$0xff] }
  0x18   :  { %339 = vmatpush.msra.mxu1 %v67_v42  ;;  %317 = vmatpush.msra.mxu0 %v50_v44  ;;  %v173_v5 = vld [vmem:[%s1575_s1 + $0x3f8] sm:$0xff]  ;;  %v123_v6 = vld [vmem:[%s1575_s1 + $0x268] sm:$0xff]  ;;  %v140_v7 = vld [vmem:[%s1575_s1 + $0x2f0] sm:$0xff] }
  0x19   :  { %385 = vmatpush.msra.mxu3 %v99_v43  ;;  %363 = vmatpush.msra.mxu2 %v82_v45  ;;  %v155_v8 = vld [vmem:[%s1575_s1 + $0x368] sm:$0xff]  ;;  %v172_v9 = vld [vmem:[%s1575_s1 + $0x3f0] sm:$0xff]  ;;  %v122_v10 = vld [vmem:[%s1575_s1 + $0x260] sm:$0xff] }
  0x1a   :  { %340 = vmatpush.msra.mxu1 %v66_v46  ;;  %318 = vmatpush.msra.mxu0 %v49_v48  ;;  %v139_v11 = vld [vmem:[%s1575_s1 + $0x2e8] sm:$0xff]  ;;  %v154_v12 = vld [vmem:[%s1575_s1 + $0x360] sm:$0xff]  ;;  %v121_v14 = vld [vmem:[%s1575_s1 + $0x258] sm:$0xff] }
  0x1b   :  { %386 = vmatpush.msra.mxu3 %v98_v47  ;;  %364 = vmatpush.msra.mxu2 %v81_v49  ;;  %v171_v13 = vld [vmem:[%s1575_s1 + $0x3e8] sm:$0xff]  ;;  %v138_v15 = vld [vmem:[%s1575_s1 + $0x2e0] sm:$0xff]  ;;  %v153_v16 = vld [vmem:[%s1575_s1 + $0x358] sm:$0xff] }
  0x1c   :  { %341 = vmatpush.msra.mxu1 %v65_v50  ;;  %319 = vmatpush.msra.mxu0 %v48_v52  ;;  %v170_v17 = vld [vmem:[%s1575_s1 + $0x3e0] sm:$0xff]  ;;  %v120_v18 = vld [vmem:[%s1575_s1 + $0x250] sm:$0xff]  ;;  %v137_v19 = vld [vmem:[%s1575_s1 + $0x2d8] sm:$0xff] }
  0x1d   :  { %387 = vmatpush.msra.mxu3 %v97_v51  ;;  %365 = vmatpush.msra.mxu2 %v80_v53  ;;  %v152_v20 = vld [vmem:[%s1575_s1 + $0x350] sm:$0xff]  ;;  %v169_v21 = vld [vmem:[%s1575_s1 + $0x3d8] sm:$0xff]  ;;  %v119_v22 = vld [vmem:[%s1575_s1 + $0x248] sm:$0xff] }
  0x1e   :  { %342 = vmatpush.msra.mxu1 %v64_v54  ;;  %320 = vmatpush.msra.mxu0 %v47_v56  ;;  %v136_v23 = vld [vmem:[%s1575_s1 + $0x2d0] sm:$0xff]  ;;  %v151_v24 = vld [vmem:[%s1575_s1 + $0x348] sm:$0xff]  ;;  %v118_v26 = vld [vmem:[%s1575_s1 + $0x240] sm:$0xff] }
  0x1f   :  { %388 = vmatpush.msra.mxu3 %v96_v55  ;;  %366 = vmatpush.msra.mxu2 %v79_v57  ;;  %v168_v25 = vld [vmem:[%s1575_s1 + $0x3d0] sm:$0xff]  ;;  %v135_v27 = vld [vmem:[%s1575_s1 + $0x2c8] sm:$0xff]  ;;  %v150_v28 = vld [vmem:[%s1575_s1 + $0x340] sm:$0xff] }
  0x20   :  { %343 = vmatpush.msra.mxu1 %v63_v58  ;;  %321 = vmatpush.msra.mxu0 %v46_v60  ;;  %v167_v29 = vld [vmem:[%s1575_s1 + $0x3c8] sm:$0xff]  ;;  %v117_v30 = vld [vmem:[%s1575_s1 + $0x238] sm:$0xff]  ;;  %v134_v31 = vld [vmem:[%s1575_s1 + $0x2c0] sm:$0xff] }
  0x21   :  { %389 = vmatpush.msra.mxu3 %v95_v59  ;;  %367 = vmatpush.msra.mxu2 %v78_v61  ;;  %v149_v32 = vld [vmem:[%s1575_s1 + $0x338] sm:$0xff]  ;;  %v166_v33 = vld [vmem:[%s1575_s1 + $0x3c0] sm:$0xff]  ;;  %v116_v34 = vld [vmem:[%s1575_s1 + $0x230] sm:$0xff] }
  0x22   :  { %398 = vmatpush.msrb.mxu0 %v125_v62  ;;  %344 = vmatpush.msra.mxu1 %v62_v0  ;;  %v133_v35 = vld [vmem:[%s1575_s1 + $0x2b8] sm:$0xff]  ;;  %v148_v36 = vld [vmem:[%s1575_s1 + $0x330] sm:$0xff]  ;;  %v115_v38 = vld [vmem:[%s1575_s1 + $0x228] sm:$0xff] }
  0x23   :  { %444 = vmatpush.msrb.mxu2 %v157_v63  ;;  %390 = vmatpush.msra.mxu3 %v94_v1  ;;  %v165_v37 = vld [vmem:[%s1575_s1 + $0x3b8] sm:$0xff]  ;;  %v132_v39 = vld [vmem:[%s1575_s1 + $0x2b0] sm:$0xff]  ;;  %v147_v40 = vld [vmem:[%s1575_s1 + $0x328] sm:$0xff] }
  0x24   :  { %399 = vmatpush.msrb.mxu0 %v124_v2  ;;  %421 = vmatpush.msrb.mxu1 %v141_v3  ;;  %v164_v41 = vld [vmem:[%s1575_s1 + $0x3b0] sm:$0xff]  ;;  %v114_v42 = vld [vmem:[%s1575_s1 + $0x220] sm:$0xff]  ;;  %v131_v43 = vld [vmem:[%s1575_s1 + $0x2a8] sm:$0xff] }
  0x25   :  { %445 = vmatpush.msrb.mxu2 %v156_v4  ;;  %467 = vmatpush.msrb.mxu3 %v173_v5  ;;  %v146_v44 = vld [vmem:[%s1575_s1 + $0x320] sm:$0xff]  ;;  %v163_v45 = vld [vmem:[%s1575_s1 + $0x3a8] sm:$0xff]  ;;  %v16_v46 = vld [vmem:[%s1576_s0 + $0x10] sm:$0xff] }
  0x26   :  { %400 = vmatpush.msrb.mxu0 %v123_v6  ;;  %422 = vmatpush.msrb.mxu1 %v140_v7  ;;  %v113_v47 = vld [vmem:[%s1575_s1 + $0x218] sm:$0xff]  ;;  %v130_v48 = vld [vmem:[%s1575_s1 + $0x2a0] sm:$0xff]  ;;  %v112_v53 = vld [vmem:[%s1575_s1 + $0x210] sm:$0xff] }
  0x27   :  { %446 = vmatpush.msrb.mxu2 %v155_v8  ;;  %468 = vmatpush.msrb.mxu3 %v172_v9  ;;  %v145_v49 = vld [vmem:[%s1575_s1 + $0x318] sm:$0xff]  ;;  %v162_v50 = vld [vmem:[%s1575_s1 + $0x3a0] sm:$0xff]  ;;  %v144_v55 = vld [vmem:[%s1575_s1 + $0x310] sm:$0xff] }
  0x28   :  { %401 = vmatpush.msrb.mxu0 %v122_v10  ;;  %423 = vmatpush.msrb.mxu1 %v139_v11  ;;  %v14_v51 = vld [vmem:[%s1576_s0] sm:$0xff]  ;;  %v17_v52 = vld [vmem:[%s1576_s0 + $0x18] sm:$0xff]  ;;  %v15_v57 = vld [vmem:[%s1576_s0 + $0x8] sm:$0xff] }
  0x29   :  { %447 = vmatpush.msrb.mxu2 %v154_v12  ;;  %469 = vmatpush.msrb.mxu3 %v171_v13  ;;  %v129_v54 = vld [vmem:[%s1575_s1 + $0x298] sm:$0xff]  ;;  %v111_v58 = vld [vmem:[%s1575_s1 + $0x208] sm:$0xff]  ;;  %v128_v59 = vld [vmem:[%s1575_s1 + $0x290] sm:$0xff] }
  0x2a   :  { %402 = vmatpush.msrb.mxu0 %v121_v14  ;;  %424 = vmatpush.msrb.mxu1 %v138_v15  ;;  %v161_v56 = vld [vmem:[%s1575_s1 + $0x398] sm:$0xff]  ;;  %v143_v60 = vld [vmem:[%s1575_s1 + $0x308] sm:$0xff]  ;;  %v160_v61 = vld [vmem:[%s1575_s1 + $0x390] sm:$0xff] }
  0x2b   :  { %448 = vmatpush.msrb.mxu2 %v153_v16  ;;  %470 = vmatpush.msrb.mxu3 %v170_v17  ;;  %v110_v62 = vld [vmem:[%s1575_s1 + $0x200] sm:$0xff]  ;;  %v127_v63 = vld [vmem:[%s1575_s1 + $0x288] sm:$0xff]  ;;  %v32_v2 = vld [vmem:[%s1576_s0 + $0x90] sm:$0xff] }
  0x2c   :  { %403 = vmatpush.msrb.mxu0 %v120_v18  ;;  %425 = vmatpush.msrb.mxu1 %v137_v19  ;;  %v142_v0 = vld [vmem:[%s1575_s1 + $0x300] sm:$0xff]  ;;  %v159_v1 = vld [vmem:[%s1575_s1 + $0x388] sm:$0xff]  ;;  %v189_v3 = vld [vmem:[%s1575_s1 + $0x478] sm:$0xff] }
  0x2d   :  { %449 = vmatpush.msrb.mxu2 %v152_v20  ;;  %471 = vmatpush.msrb.mxu3 %v169_v21  ;;  %v221_v4 = vld [vmem:[%s1575_s1 + $0x578] sm:$0xff]  ;;  %v126_v5 = vld [vmem:[%s1575_s1 + $0x280] sm:$0xff]  ;;  %v188_v9 = vld [vmem:[%s1575_s1 + $0x470] sm:$0xff] }
  0x2e   :  { %404 = vmatpush.msrb.mxu0 %v119_v22  ;;  %426 = vmatpush.msrb.mxu1 %v136_v23  ;;  %v158_v6 = vld [vmem:[%s1575_s1 + $0x380] sm:$0xff]  ;;  %v33_v8 = vld [vmem:[%s1576_s0 + $0x98] sm:$0xff]  ;;  %v220_v11 = vld [vmem:[%s1575_s1 + $0x570] sm:$0xff] }
  0x2f   :  { %450 = vmatpush.msrb.mxu2 %v151_v24  ;;  %472 = vmatpush.msrb.mxu3 %v168_v25  ;;  %v30_v7 = vld [vmem:[%s1576_s0 + $0x80] sm:$0xff]  ;;  %v205_v10 = vld [vmem:[%s1575_s1 + $0x4f8] sm:$0xff]  ;;  %v31_v13 = vld [vmem:[%s1576_s0 + $0x88] sm:$0xff] }
  0x30   :  { %405 = vmatpush.msrb.mxu0 %v118_v26  ;;  %427 = vmatpush.msrb.mxu1 %v135_v27  ;;  %v237_v12 = vld [vmem:[%s1575_s1 + $0x5f8] sm:$0xff]  ;;  %v187_v14 = vld [vmem:[%s1575_s1 + $0x468] sm:$0xff]  ;;  %v204_v15 = vld [vmem:[%s1575_s1 + $0x4f0] sm:$0xff] }
  0x31   :  { %451 = vmatpush.msrb.mxu2 %v150_v28  ;;  %473 = vmatpush.msrb.mxu3 %v167_v29  ;;  %v219_v16 = vld [vmem:[%s1575_s1 + $0x568] sm:$0xff]  ;;  %v236_v17 = vld [vmem:[%s1575_s1 + $0x5f0] sm:$0xff]  ;;  %v186_v18 = vld [vmem:[%s1575_s1 + $0x460] sm:$0xff] }
  0x32   :  { %406 = vmatpush.msrb.mxu0 %v117_v30  ;;  %428 = vmatpush.msrb.mxu1 %v134_v31  ;;  %v203_v19 = vld [vmem:[%s1575_s1 + $0x4e8] sm:$0xff]  ;;  %v218_v20 = vld [vmem:[%s1575_s1 + $0x560] sm:$0xff]  ;;  %v20_v22 = vld [vmem:[%s1576_s0 + $0x30] sm:$0xff] }
  0x33   :  { %452 = vmatpush.msrb.mxu2 %v149_v32  ;;  %474 = vmatpush.msrb.mxu3 %v166_v33  ;;  %v235_v21 = vld [vmem:[%s1575_s1 + $0x5e8] sm:$0xff]  ;;  %v185_v23 = vld [vmem:[%s1575_s1 + $0x458] sm:$0xff]  ;;  %v202_v24 = vld [vmem:[%s1575_s1 + $0x4e0] sm:$0xff] }
  0x34   :  { %407 = vmatpush.msrb.mxu0 %v116_v34  ;;  %429 = vmatpush.msrb.mxu1 %v133_v35  ;;  %v217_v25 = vld [vmem:[%s1575_s1 + $0x558] sm:$0xff]  ;;  %v234_v26 = vld [vmem:[%s1575_s1 + $0x5e0] sm:$0xff]  ;;  %v184_v29 = vld [vmem:[%s1575_s1 + $0x450] sm:$0xff] }
  0x35   :  { %453 = vmatpush.msrb.mxu2 %v148_v36  ;;  %475 = vmatpush.msrb.mxu3 %v165_v37  ;;  %v18_v27 = vld [vmem:[%s1576_s0 + $0x20] sm:$0xff]  ;;  %v21_v28 = vld [vmem:[%s1576_s0 + $0x38] sm:$0xff]  ;;  %v216_v31 = vld [vmem:[%s1575_s1 + $0x550] sm:$0xff] }
  0x36   :  { %408 = vmatpush.msrb.mxu0 %v115_v38  ;;  %430 = vmatpush.msrb.mxu1 %v132_v39  ;;  %v201_v30 = vld [vmem:[%s1575_s1 + $0x4d8] sm:$0xff]  ;;  %v19_v33 = vld [vmem:[%s1576_s0 + $0x28] sm:$0xff]  ;;  %v200_v35 = vld [vmem:[%s1575_s1 + $0x4d0] sm:$0xff] }
  0x37   :  { %454 = vmatpush.msrb.mxu2 %v147_v40  ;;  %476 = vmatpush.msrb.mxu3 %v164_v41  ;;  %v233_v32 = vld [vmem:[%s1575_s1 + $0x5d8] sm:$0xff]  ;;  %v183_v34 = vld [vmem:[%s1575_s1 + $0x448] sm:$0xff]  ;;  %v232_v37 = vld [vmem:[%s1575_s1 + $0x5d0] sm:$0xff] }
  0x38   :  { %409 = vmatpush.msrb.mxu0 %v114_v42  ;;  %431 = vmatpush.msrb.mxu1 %v131_v43  ;;  %v215_v36 = vld [vmem:[%s1575_s1 + $0x548] sm:$0xff]  ;;  %v182_v38 = vld [vmem:[%s1575_s1 + $0x440] sm:$0xff]  ;;  %v181_v42 = vld [vmem:[%s1575_s1 + $0x438] sm:$0xff] }
  0x39   :  { %455 = vmatpush.msrb.mxu2 %v146_v44  ;;  %477 = vmatpush.msrb.mxu3 %v163_v45  ;;  %v199_v39 = vld [vmem:[%s1575_s1 + $0x4c8] sm:$0xff]  ;;  %v214_v40 = vld [vmem:[%s1575_s1 + $0x540] sm:$0xff]  ;;  %v213_v44 = vld [vmem:[%s1575_s1 + $0x538] sm:$0xff] }
  0x3a   :  { %368 = vmatmul.f32.vlgmr.msra.gmra.mxu2 %v16_v46  ;;  %410 = vmatpush.msrb.mxu0 %v113_v47  ;;  %v231_v41 = vld [vmem:[%s1575_s1 + $0x5c8] sm:$0xff]  ;;  %v198_v43 = vld [vmem:[%s1575_s1 + $0x4c0] sm:$0xff]  ;;  %v180_v46 = vld [vmem:[%s1575_s1 + $0x430] sm:$0xff] }
  0x3b   :  { %432 = vmatpush.msrb.mxu1 %v130_v48  ;;  %456 = vmatpush.msrb.mxu2 %v145_v49  ;;  %v230_v45 = vld [vmem:[%s1575_s1 + $0x5c0] sm:$0xff]  ;;  %v197_v47 = vld [vmem:[%s1575_s1 + $0x4b8] sm:$0xff]  ;;  %v212_v48 = vld [vmem:[%s1575_s1 + $0x530] sm:$0xff] }
  0x3c   :  { %478 = vmatpush.msrb.mxu3 %v162_v50  ;;  %322 = vmatmul.f32.vlgmr.msra.gmra.mxu0 %v14_v51  ;;  %v229_v49 = vld [vmem:[%s1575_s1 + $0x5b8] sm:$0xff]  ;;  %v179_v50 = vld [vmem:[%s1575_s1 + $0x428] sm:$0xff]  ;;  %v196_v51 = vld [vmem:[%s1575_s1 + $0x4b0] sm:$0xff] }
  0x3d   :  { %391 = vmatmul.f32.vlgmr.msra.gmra.mxu3 %v17_v52  ;;  %411 = vmatpush.msrb.mxu0 %v112_v53  ;;  %v211_v52 = vld [vmem:[%s1575_s1 + $0x528] sm:$0xff]  ;;  %v228_v53 = vld [vmem:[%s1575_s1 + $0x5b0] sm:$0xff] }
  0x3e   :  { %433 = vmatpush.msrb.mxu1 %v129_v54  ;;  %457 = vmatpush.msrb.mxu2 %v144_v55  ;;  %v178_v54 = vld [vmem:[%s1575_s1 + $0x420] sm:$0xff]  ;;  %v195_v55 = vld [vmem:[%s1575_s1 + $0x4a8] sm:$0xff] }
  0x3f   :  { %479 = vmatpush.msrb.mxu3 %v161_v56  ;;  %345 = vmatmul.f32.vlgmr.msra.gmra.mxu1 %v15_v57  ;;  %v210_v56 = vld [vmem:[%s1575_s1 + $0x520] sm:$0xff]  ;;  %v227_v57 = vld [vmem:[%s1575_s1 + $0x5a8] sm:$0xff] }
  0x40   :  { %412 = vmatpush.msrb.mxu0 %v111_v58  ;;  %434 = vmatpush.msrb.mxu1 %v128_v59  ;;  %v34_v58 = vld [vmem:[%s1576_s0 + $0xa0] sm:$0xff]  ;;  %v36_v59 = vld [vmem:[%s1576_s0 + $0xb0] sm:$0xff] }
  0x41   :  { %458 = vmatpush.msrb.mxu2 %v143_v60  ;;  %480 = vmatpush.msrb.mxu3 %v160_v61  ;;  %v177_v60 = vld [vmem:[%s1575_s1 + $0x418] sm:$0xff]  ;;  %v194_v61 = vld [vmem:[%s1575_s1 + $0x4a0] sm:$0xff] }
  0x42   :  { %413 = vmatpush.msrb.mxu0 %v110_v62  ;;  %435 = vmatpush.msrb.mxu1 %v127_v63  ;;  %v209_v62 = vld [vmem:[%s1575_s1 + $0x518] sm:$0xff]  ;;  %v226_v63 = vld [vmem:[%s1575_s1 + $0x5a0] sm:$0xff] }
  0x43   :  { %459 = vmatpush.msrb.mxu2 %v142_v0  ;;  %481 = vmatpush.msrb.mxu3 %v159_v1  ;;  %v35_v0 = vld [vmem:[%s1576_s0 + $0xa8] sm:$0xff]  ;;  %v37_v1 = vld [vmem:[%s1576_s0 + $0xb8] sm:$0xff] }
  0x44   :  { %371 = vmatmul.f32.gmra.mxu2 %v32_v2  ;;  %490 = vmatpush.msra.mxu0 %v189_v3  ;;  %v176_v2 = vld [vmem:[%s1575_s1 + $0x410] sm:$0xff]  ;;  %v193_v3 = vld [vmem:[%s1575_s1 + $0x498] sm:$0xff] }
  0x45   :  { %536 = vmatpush.msra.mxu2 %v221_v4  ;;  %436 = vmatpush.msrb.mxu1 %v126_v5  ;;  %v208_v4 = vld [vmem:[%s1575_s1 + $0x510] sm:$0xff]  ;;  %v225_v5 = vld [vmem:[%s1575_s1 + $0x598] sm:$0xff] }
  0x46   :  { %482 = vmatpush.msrb.mxu3 %v158_v6  ;;  %325 = vmatmul.f32.gmra.mxu0 %v30_v7  ;;  %v175_v6 = vld [vmem:[%s1575_s1 + $0x408] sm:$0xff]  ;;  %v192_v7 = vld [vmem:[%s1575_s1 + $0x490] sm:$0xff] }
  0x47   :  { %394 = vmatmul.f32.gmra.mxu3 %v33_v8  ;;  %491 = vmatpush.msra.mxu0 %v188_v9  ;;  %v207_v8 = vld [vmem:[%s1575_s1 + $0x508] sm:$0xff]  ;;  %v224_v9 = vld [vmem:[%s1575_s1 + $0x590] sm:$0xff] }
  0x48   :  { %513 = vmatpush.msra.mxu1 %v205_v10  ;;  %537 = vmatpush.msra.mxu2 %v220_v11  ;;  %v174_v10 = vld [vmem:[%s1575_s1 + $0x400] sm:$0xff]  ;;  %v191_v11 = vld [vmem:[%s1575_s1 + $0x488] sm:$0xff] }
  0x49   :  { %559 = vmatpush.msra.mxu3 %v237_v12  ;;  %348 = vmatmul.f32.gmra.mxu1 %v31_v13  ;;  %v206_v12 = vld [vmem:[%s1575_s1 + $0x500] sm:$0xff]  ;;  %v223_v13 = vld [vmem:[%s1575_s1 + $0x588] sm:$0xff] }
  0x4a   :  { %492 = vmatpush.msra.mxu0 %v187_v14  ;;  %514 = vmatpush.msra.mxu1 %v204_v15  ;;  %v22_v14 = vld [vmem:[%s1576_s0 + $0x40] sm:$0xff]  ;;  %v24_v15 = vld [vmem:[%s1576_s0 + $0x50] sm:$0xff] }
  0x4b   :  { %538 = vmatpush.msra.mxu2 %v219_v16  ;;  %560 = vmatpush.msra.mxu3 %v236_v17  ;;  %v253_v16 = vld [vmem:[%s1575_s1 + $0x678] sm:$0xff] }
  0x4c   :  { %493 = vmatpush.msra.mxu0 %v186_v18  ;;  %515 = vmatpush.msra.mxu1 %v203_v19  ;;  %v285_v17 = vld [vmem:[%s1575_s1 + $0x778] sm:$0xff]  ;;  %v190_v18 = vld [vmem:[%s1575_s1 + $0x480] sm:$0xff] }
  0x4d   :  { %539 = vmatpush.msra.mxu2 %v218_v20  ;;  %561 = vmatpush.msra.mxu3 %v235_v21  ;;  %v222_v19 = vld [vmem:[%s1575_s1 + $0x580] sm:$0xff]  ;;  %v23_v20 = vld [vmem:[%s1576_s0 + $0x48] sm:$0xff]  ;;  %v25_v21 = vld [vmem:[%s1576_s0 + $0x58] sm:$0xff] }
  0x4e   :  { %460 = vmatmul.f32.vlgmr.msrb.gmra.mxu2 %v20_v22  ;;  %494 = vmatpush.msra.mxu0 %v185_v23  ;;  %v252_v22 = vld [vmem:[%s1575_s1 + $0x670] sm:$0xff]  ;;  %v269_v23 = vld [vmem:[%s1575_s1 + $0x6f8] sm:$0xff] }
  0x4f   :  { %516 = vmatpush.msra.mxu1 %v202_v24  ;;  %540 = vmatpush.msra.mxu2 %v217_v25  ;;  %v284_v24 = vld [vmem:[%s1575_s1 + $0x770] sm:$0xff]  ;;  %v301_v25 = vld [vmem:[%s1575_s1 + $0x7f8] sm:$0xff] }
  0x50   :  { %562 = vmatpush.msra.mxu3 %v234_v26  ;;  %414 = vmatmul.f32.vlgmr.msrb.gmra.mxu0 %v18_v27  ;;  %v251_v26 = vld [vmem:[%s1575_s1 + $0x668] sm:$0xff]  ;;  %v268_v27 = vld [vmem:[%s1575_s1 + $0x6f0] sm:$0xff] }
  0x51   :  { %483 = vmatmul.f32.vlgmr.msrb.gmra.mxu3 %v21_v28  ;;  %495 = vmatpush.msra.mxu0 %v184_v29  ;;  %v283_v28 = vld [vmem:[%s1575_s1 + $0x768] sm:$0xff]  ;;  %v300_v29 = vld [vmem:[%s1575_s1 + $0x7f0] sm:$0xff] }
  0x52   :  { %517 = vmatpush.msra.mxu1 %v201_v30  ;;  %541 = vmatpush.msra.mxu2 %v216_v31  ;;  %v250_v30 = vld [vmem:[%s1575_s1 + $0x660] sm:$0xff]  ;;  %v267_v31 = vld [vmem:[%s1575_s1 + $0x6e8] sm:$0xff] }
  0x53   :  { %563 = vmatpush.msra.mxu3 %v233_v32  ;;  %437 = vmatmul.f32.vlgmr.msrb.gmra.mxu1 %v19_v33  ;;  %v282_v32 = vld [vmem:[%s1575_s1 + $0x760] sm:$0xff]  ;;  %v299_v33 = vld [vmem:[%s1575_s1 + $0x7e8] sm:$0xff] }
  0x54   :  { %496 = vmatpush.msra.mxu0 %v183_v34  ;;  %518 = vmatpush.msra.mxu1 %v200_v35  ;;  %v40_v34 = vld [vmem:[%s1576_s0 + $0xd0] sm:$0xff]  ;;  %v249_v35 = vld [vmem:[%s1575_s1 + $0x658] sm:$0xff] }
  0x55   :  { %542 = vmatpush.msra.mxu2 %v215_v36  ;;  %564 = vmatpush.msra.mxu3 %v232_v37  ;;  %v266_v36 = vld [vmem:[%s1575_s1 + $0x6e0] sm:$0xff]  ;;  %v281_v37 = vld [vmem:[%s1575_s1 + $0x758] sm:$0xff] }
  0x56   :  { %497 = vmatpush.msra.mxu0 %v182_v38  ;;  %519 = vmatpush.msra.mxu1 %v199_v39  ;;  %v298_v38 = vld [vmem:[%s1575_s1 + $0x7e0] sm:$0xff] }
  0x57   :  { %543 = vmatpush.msra.mxu2 %v214_v40  ;;  %565 = vmatpush.msra.mxu3 %v231_v41  ;;  %v38_v39 = vld [vmem:[%s1576_s0 + $0xc0] sm:$0xff]  ;;  %v41_v40 = vld [vmem:[%s1576_s0 + $0xd8] sm:$0xff]  ;;  %v248_v41 = vld [vmem:[%s1575_s1 + $0x650] sm:$0xff] }
  0x58   :  { %498 = vmatpush.msra.mxu0 %v181_v42  ;;  %520 = vmatpush.msra.mxu1 %v198_v43  ;;  %v265_v42 = vld [vmem:[%s1575_s1 + $0x6d8] sm:$0xff]  ;;  %v280_v43 = vld [vmem:[%s1575_s1 + $0x750] sm:$0xff] }
  0x59   :  { %544 = vmatpush.msra.mxu2 %v213_v44  ;;  %566 = vmatpush.msra.mxu3 %v230_v45  ;;  %v297_v44 = vld [vmem:[%s1575_s1 + $0x7d8] sm:$0xff]  ;;  %v39_v45 = vld [vmem:[%s1576_s0 + $0xc8] sm:$0xff] }
  0x5a   :  { %499 = vmatpush.msra.mxu0 %v180_v46  ;;  %521 = vmatpush.msra.mxu1 %v197_v47  ;;  %v247_v46 = vld [vmem:[%s1575_s1 + $0x648] sm:$0xff]  ;;  %v264_v47 = vld [vmem:[%s1575_s1 + $0x6d0] sm:$0xff] }
  0x5b   :  { %545 = vmatpush.msra.mxu2 %v212_v48  ;;  %567 = vmatpush.msra.mxu3 %v229_v49  ;;  %v279_v48 = vld [vmem:[%s1575_s1 + $0x748] sm:$0xff]  ;;  %v296_v49 = vld [vmem:[%s1575_s1 + $0x7d0] sm:$0xff] }
  0x5c   :  { %500 = vmatpush.msra.mxu0 %v179_v50  ;;  %522 = vmatpush.msra.mxu1 %v196_v51  ;;  %v246_v50 = vld [vmem:[%s1575_s1 + $0x640] sm:$0xff]  ;;  %v263_v51 = vld [vmem:[%s1575_s1 + $0x6c8] sm:$0xff] }
  0x5d   :  { %546 = vmatpush.msra.mxu2 %v211_v52  ;;  %568 = vmatpush.msra.mxu3 %v228_v53  ;;  %v278_v52 = vld [vmem:[%s1575_s1 + $0x740] sm:$0xff]  ;;  %v295_v53 = vld [vmem:[%s1575_s1 + $0x7c8] sm:$0xff] }
  0x5e   :  { %501 = vmatpush.msra.mxu0 %v178_v54  ;;  %523 = vmatpush.msra.mxu1 %v195_v55  ;;  %v245_v54 = vld [vmem:[%s1575_s1 + $0x638] sm:$0xff]  ;;  %v262_v55 = vld [vmem:[%s1575_s1 + $0x6c0] sm:$0xff] }
  0x5f   :  { %547 = vmatpush.msra.mxu2 %v210_v56  ;;  %569 = vmatpush.msra.mxu3 %v227_v57  ;;  %v277_v56 = vld [vmem:[%s1575_s1 + $0x738] sm:$0xff]  ;;  %v294_v57 = vld [vmem:[%s1575_s1 + $0x7c0] sm:$0xff] }
  0x60   :  { %417 = vmatmul.f32.gmra.mxu0 %v34_v58  ;;  %463 = vmatmul.f32.gmra.mxu2 %v36_v59  ;;  %v244_v58 = vld [vmem:[%s1575_s1 + $0x630] sm:$0xff]  ;;  %v261_v59 = vld [vmem:[%s1575_s1 + $0x6b8] sm:$0xff] }
  0x61   :  { %502 = vmatpush.msra.mxu0 %v177_v60  ;;  %524 = vmatpush.msra.mxu1 %v194_v61  ;;  %v276_v60 = vld [vmem:[%s1575_s1 + $0x730] sm:$0xff]  ;;  %v293_v61 = vld [vmem:[%s1575_s1 + $0x7b8] sm:$0xff] }
  0x62   :  { %548 = vmatpush.msra.mxu2 %v209_v62  ;;  %570 = vmatpush.msra.mxu3 %v226_v63  ;;  %v243_v62 = vld [vmem:[%s1575_s1 + $0x628] sm:$0xff]  ;;  %v260_v63 = vld [vmem:[%s1575_s1 + $0x6b0] sm:$0xff] }
  0x63   :  { %440 = vmatmul.f32.gmra.mxu1 %v35_v0  ;;  %486 = vmatmul.f32.gmra.mxu3 %v37_v1  ;;  %v275_v0 = vld [vmem:[%s1575_s1 + $0x728] sm:$0xff]  ;;  %v292_v1 = vld [vmem:[%s1575_s1 + $0x7b0] sm:$0xff] }
  0x64   :  { %503 = vmatpush.msra.mxu0 %v176_v2  ;;  %525 = vmatpush.msra.mxu1 %v193_v3  ;;  %v242_v2 = vld [vmem:[%s1575_s1 + $0x620] sm:$0xff]  ;;  %v259_v3 = vld [vmem:[%s1575_s1 + $0x6a8] sm:$0xff] }
  0x65   :  { %549 = vmatpush.msra.mxu2 %v208_v4  ;;  %571 = vmatpush.msra.mxu3 %v225_v5  ;;  %v274_v4 = vld [vmem:[%s1575_s1 + $0x720] sm:$0xff]  ;;  %v291_v5 = vld [vmem:[%s1575_s1 + $0x7a8] sm:$0xff] }
  0x66   :  { %504 = vmatpush.msra.mxu0 %v175_v6  ;;  %526 = vmatpush.msra.mxu1 %v192_v7  ;;  %v241_v6 = vld [vmem:[%s1575_s1 + $0x618] sm:$0xff]  ;;  %v258_v7 = vld [vmem:[%s1575_s1 + $0x6a0] sm:$0xff] }
  0x67   :  { %550 = vmatpush.msra.mxu2 %v207_v8  ;;  %572 = vmatpush.msra.mxu3 %v224_v9  ;;  %v273_v8 = vld [vmem:[%s1575_s1 + $0x718] sm:$0xff]  ;;  %v290_v9 = vld [vmem:[%s1575_s1 + $0x7a0] sm:$0xff] }
  0x68   :  { %505 = vmatpush.msra.mxu0 %v174_v10  ;;  %527 = vmatpush.msra.mxu1 %v191_v11  ;;  %v240_v10 = vld [vmem:[%s1575_s1 + $0x610] sm:$0xff]  ;;  %v257_v11 = vld [vmem:[%s1575_s1 + $0x698] sm:$0xff] }
  0x69   :  { %551 = vmatpush.msra.mxu2 %v206_v12  ;;  %573 = vmatpush.msra.mxu3 %v223_v13  ;;  %v272_v12 = vld [vmem:[%s1575_s1 + $0x710] sm:$0xff]  ;;  %v289_v13 = vld [vmem:[%s1575_s1 + $0x798] sm:$0xff] }
  0x6a   :  { %506 = vmatmul.f32.vlgmr.msra.gmra.mxu0 %v22_v14  ;;  %552 = vmatmul.f32.vlgmr.msra.gmra.mxu2 %v24_v15  ;;  %v239_v14 = vld [vmem:[%s1575_s1 + $0x608] sm:$0xff]  ;;  %v256_v15 = vld [vmem:[%s1575_s1 + $0x690] sm:$0xff] }
  0x6b   :  { %582 = vmatpush.msrb.mxu0 %v253_v16  ;;  %628 = vmatpush.msrb.mxu2 %v285_v17  ;;  %v271_v16 = vld [vmem:[%s1575_s1 + $0x708] sm:$0xff]  ;;  %v288_v17 = vld [vmem:[%s1575_s1 + $0x790] sm:$0xff] }
  0x6c   :  { %528 = vmatpush.msra.mxu1 %v190_v18  ;;  %574 = vmatpush.msra.mxu3 %v222_v19  ;;  %v238_v18 = vld [vmem:[%s1575_s1 + $0x600] sm:$0xff]  ;;  %v255_v19 = vld [vmem:[%s1575_s1 + $0x688] sm:$0xff] }
  0x6d   :  { %529 = vmatmul.f32.vlgmr.msra.gmra.mxu1 %v23_v20  ;;  %575 = vmatmul.f32.vlgmr.msra.gmra.mxu3 %v25_v21  ;;  %v270_v20 = vld [vmem:[%s1575_s1 + $0x700] sm:$0xff]  ;;  %v287_v21 = vld [vmem:[%s1575_s1 + $0x788] sm:$0xff] }
  0x6e   :  { %583 = vmatpush.msrb.mxu0 %v252_v22  ;;  %605 = vmatpush.msrb.mxu1 %v269_v23  ;;  %v26_v22 = vld [vmem:[%s1576_s0 + $0x60] sm:$0xff]  ;;  %v28_v23 = vld [vmem:[%s1576_s0 + $0x70] sm:$0xff] }
  0x6f   :  { %629 = vmatpush.msrb.mxu2 %v284_v24  ;;  %651 = vmatpush.msrb.mxu3 %v301_v25  ;;  %v254_v24 = vld [vmem:[%s1575_s1 + $0x680] sm:$0xff] }
  0x70   :  { %584 = vmatpush.msrb.mxu0 %v251_v26  ;;  %606 = vmatpush.msrb.mxu1 %v268_v27  ;;  %v286_v25 = vld [vmem:[%s1575_s1 + $0x780] sm:$0xff]  ;;  %v27_v26 = vld [vmem:[%s1576_s0 + $0x68] sm:$0xff]  ;;  %v29_v27 = vld [vmem:[%s1576_s0 + $0x78] sm:$0xff] }
  0x71   :  { %630 = vmatpush.msrb.mxu2 %v283_v28  ;;  %652 = vmatpush.msrb.mxu3 %v300_v29  ;;  %v42_v28 = vld [vmem:[%s1576_s0 + $0xe0] sm:$0xff]  ;;  %v44_v29 = vld [vmem:[%s1576_s0 + $0xf0] sm:$0xff] }
  0x72   :  { %585 = vmatpush.msrb.mxu0 %v250_v30  ;;  %607 = vmatpush.msrb.mxu1 %v267_v31  ;;  %v43_v30 = vld [vmem:[%s1576_s0 + $0xe8] sm:$0xff]  ;;  %v45_v31 = vld [vmem:[%s1576_s0 + $0xf8] sm:$0xff] }
  0x73   :  { %631 = vmatpush.msrb.mxu2 %v282_v32  ;;  %653 = vmatpush.msrb.mxu3 %v299_v33 }
  0x74   :  { %555 = vmatmul.f32.gmra.mxu2 %v40_v34  ;;  %586 = vmatpush.msrb.mxu0 %v249_v35 }
  0x75   :  { %608 = vmatpush.msrb.mxu1 %v266_v36  ;;  %632 = vmatpush.msrb.mxu2 %v281_v37  ;;  %v681_v37 = vld [vmem:[%s1577_s2] ss:$0 sm:$0xff] }
  0x76   :  { %654 = vmatpush.msrb.mxu3 %v298_v38  ;;  %509 = vmatmul.f32.gmra.mxu0 %v38_v39 }
  0x77   :  { %578 = vmatmul.f32.gmra.mxu3 %v41_v40  ;;  %587 = vmatpush.msrb.mxu0 %v248_v41 }
  0x78   :  { %609 = vmatpush.msrb.mxu1 %v265_v42  ;;  %633 = vmatpush.msrb.mxu2 %v280_v43 }
  0x79   :  { %655 = vmatpush.msrb.mxu3 %v297_v44  ;;  %532 = vmatmul.f32.gmra.mxu1 %v39_v45 }
  0x7a   :  { %588 = vmatpush.msrb.mxu0 %v247_v46  ;;  %610 = vmatpush.msrb.mxu1 %v264_v47 }
  0x7b   :  { %634 = vmatpush.msrb.mxu2 %v279_v48  ;;  %656 = vmatpush.msrb.mxu3 %v296_v49 }
  0x7c   :  { %589 = vmatpush.msrb.mxu0 %v246_v50  ;;  %611 = vmatpush.msrb.mxu1 %v263_v51 }
  0x7d   :  { %635 = vmatpush.msrb.mxu2 %v278_v52  ;;  %657 = vmatpush.msrb.mxu3 %v295_v53 }
  0x7e   :  { %590 = vmatpush.msrb.mxu0 %v245_v54  ;;  %612 = vmatpush.msrb.mxu1 %v262_v55 }
  0x7f   :  { %636 = vmatpush.msrb.mxu2 %v277_v56  ;;  %658 = vmatpush.msrb.mxu3 %v294_v57 }
  0x80   :  { %591 = vmatpush.msrb.mxu0 %v244_v58  ;;  %613 = vmatpush.msrb.mxu1 %v261_v59 }
  0x81   :  { %637 = vmatpush.msrb.mxu2 %v276_v60  ;;  %659 = vmatpush.msrb.mxu3 %v293_v61 }
  0x82   :  { %592 = vmatpush.msrb.mxu0 %v243_v62  ;;  %614 = vmatpush.msrb.mxu1 %v260_v63 }
  0x83   :  { %638 = vmatpush.msrb.mxu2 %v275_v0  ;;  %660 = vmatpush.msrb.mxu3 %v292_v1 }
  0x84   :  { %593 = vmatpush.msrb.mxu0 %v242_v2  ;;  %615 = vmatpush.msrb.mxu1 %v259_v3 }
  0x85   :  { %639 = vmatpush.msrb.mxu2 %v274_v4  ;;  %661 = vmatpush.msrb.mxu3 %v291_v5 }
  0x86   :  { %594 = vmatpush.msrb.mxu0 %v241_v6  ;;  %616 = vmatpush.msrb.mxu1 %v258_v7 }
  0x87   :  { %640 = vmatpush.msrb.mxu2 %v273_v8  ;;  %662 = vmatpush.msrb.mxu3 %v290_v9 }
  0x88   :  { %595 = vmatpush.msrb.mxu0 %v240_v10  ;;  %617 = vmatpush.msrb.mxu1 %v257_v11 }
  0x89   :  { %641 = vmatpush.msrb.mxu2 %v272_v12  ;;  %663 = vmatpush.msrb.mxu3 %v289_v13 }
  0x8a   :  { %596 = vmatpush.msrb.mxu0 %v239_v14  ;;  %618 = vmatpush.msrb.mxu1 %v256_v15 }
  0x8b   :  { %642 = vmatpush.msrb.mxu2 %v271_v16  ;;  %664 = vmatpush.msrb.mxu3 %v288_v17 }
  0x8c   :  { %597 = vmatpush.msrb.mxu0 %v238_v18  ;;  %619 = vmatpush.msrb.mxu1 %v255_v19 }
  0x8d   :  { %643 = vmatpush.msrb.mxu2 %v270_v20  ;;  %665 = vmatpush.msrb.mxu3 %v287_v21 }
  0x8e   :  { %598 = vmatmul.f32.vlgmr.msrb.gmra.mxu0 %v26_v22  ;;  %644 = vmatmul.f32.vlgmr.msrb.gmra.mxu2 %v28_v23 }
  0x8f   :  { %620 = vmatpush.msrb.mxu1 %v254_v24  ;;  %666 = vmatpush.msrb.mxu3 %v286_v25 }
  0x90   :  { %621 = vmatmul.f32.vlgmr.msrb.gmra.mxu1 %v27_v26  ;;  %667 = vmatmul.f32.vlgmr.msrb.gmra.mxu3 %v29_v27 }
  0x96   :  { %601 = vmatmul.f32.gmra.mxu0 %v42_v28  ;;  %647 = vmatmul.f32.gmra.mxu2 %v44_v29 }
  0x98   :  { %624 = vmatmul.f32.gmra.mxu1 %v43_v30  ;;  %670 = vmatmul.f32.gmra.mxu3 %v45_v31 }
  0xb9   :  { %v323_v32 = vpop.f32.mrf.mxu0 }
  0xba   :  { %v324_v39 = vadd.f32 %v681_v37, %v323_v32 }
  0xbc   :  { %v346_v33 = vpop.f32.mrf.mxu1 }
  0xbd   :  { %v369_v34 = vpop.f32.mrf.mxu2  ;;  %v347_v42 = vadd.f32 %v346_v33, %v324_v39 }
  0xbf   :  { %v370_v46 = vadd.f32 %v369_v34, %v347_v42 }
  0xc0   :  { %v392_v35 = vpop.f32.mrf.mxu3 }
  0xc1   :  { %v393_v49 = vadd.f32 %v392_v35, %v370_v46 }
  0xc3   :  { %v326_v36 = vpop.f32.mrf.mxu0 }
  0xc4   :  { %v327_v43 = vadd.f32 %v681_v37, %v326_v36 }
  0xc6   :  { %v349_v38 = vpop.f32.mrf.mxu1 }
  0xc7   :  { %v372_v40 = vpop.f32.mrf.mxu2  ;;  %v350_v47 = vadd.f32 %v349_v38, %v327_v43 }
  0xc9   :  { %v373_v50 = vadd.f32 %v372_v40, %v350_v47 }
  0xca   :  { %v395_v41 = vpop.f32.mrf.mxu3 }
  0xcb   :  { %v396_v54 = vadd.f32 %v395_v41, %v373_v50 }
  0xcd   :  { %v415_v44 = vpop.f32.mrf.mxu0 }
  0xce   :  { %v416_v55 = vadd.f32 %v415_v44, %v393_v49 }
  0xd0   :  { %v438_v45 = vpop.f32.mrf.mxu1 }
  0xd1   :  { %v461_v48 = vpop.f32.mrf.mxu2  ;;  %v439_v57 = vadd.f32 %v438_v45, %v416_v55 }
  0xd3   :  { %v462_v61 = vadd.f32 %v461_v48, %v439_v57 }
  0xd4   :  { %v484_v51 = vpop.f32.mrf.mxu3 }
  0xd5   :  { %v485_v0 = vadd.f32 %v484_v51, %v462_v61 }
  0xdd   :  { %v418_v52 = vpop.f32.mrf.mxu0 }
  0xde   :  { %v419_v58 = vadd.f32 %v418_v52, %v396_v54 }
  0xe0   :  { %v441_v53 = vpop.f32.mrf.mxu1 }
  0xe1   :  { %v442_v62 = vadd.f32 %v441_v53, %v419_v58 }
  0xe3   :  { %v464_v56 = vpop.f32.mrf.mxu2 }
  0xe4   :  { %v465_v1 = vadd.f32 %v464_v56, %v442_v62 }
  0xe6   :  { %v487_v59 = vpop.f32.mrf.mxu3 }
  0xe7   :  { %v507_v60 = vpop.f32.mrf.mxu0  ;;  %v488_v5 = vadd.f32 %v487_v59, %v465_v1 }
  0xe8   :  { %v508_v3 = vadd.f32 %v507_v60, %v485_v0 }
  0xea   :  { %v530_v63 = vpop.f32.mrf.mxu1 }
  0xeb   :  { %v531_v7 = vadd.f32 %v530_v63, %v508_v3 }
  0xed   :  { %v553_v2 = vpop.f32.mrf.mxu2 }
  0xee   :  { %v554_v9 = vadd.f32 %v553_v2, %v531_v7 }
  0xf0   :  { %v576_v4 = vpop.f32.mrf.mxu3 }
  0xf1   :  { %v577_v12 = vadd.f32 %v576_v4, %v554_v9 }
  0xf3   :  { %v510_v6 = vpop.f32.mrf.mxu0 }
  0xf4   :  { %v511_v10 = vadd.f32 %v510_v6, %v488_v5 }
  0xf6   :  { %v533_v8 = vpop.f32.mrf.mxu1 }
  0xf7   :  { %v556_v11 = vpop.f32.mrf.mxu2  ;;  %v534_v13 = vadd.f32 %v533_v8, %v511_v10 }
  0xf9   :  { %v557_v18 = vadd.f32 %v556_v11, %v534_v13 }
  0xfa   :  { %v579_v14 = vpop.f32.mrf.mxu3 }
  0xfb   :  { %v580_v21 = vadd.f32 %v579_v14, %v557_v18 }
 0x10b   :  { %v599_v15 = vpop.f32.mrf.mxu0 }
 0x10c   :  { %v600_v16 = vadd.f32 %v599_v15, %v577_v12 }
 0x10d   :  { %v622_v17 = vpop.f32.mrf.mxu1 }
 0x10e   :  { %v623_v19 = vadd.f32 %v622_v17, %v600_v16 }
 0x111   :  { %v645_v20 = vpop.f32.mrf.mxu2 }
 0x112   :  { %v646_v22 = vadd.f32 %v645_v20, %v623_v19 }
 0x113   :  { %v602_v23 = vpop.f32.mrf.mxu0  ;;  %v668_v24 = vpop.f32.mrf.mxu3 }
 0x114   :  { %v603_v25 = vadd.f32 %v602_v23, %v580_v21  ;;  %v669_v26 = vadd.f32 %v668_v24, %v646_v22 }
 0x115   :  { %v625_v27 = vpop.f32.mrf.mxu1 }
 0x116   :  { %675 = vst.msk [vmem:[%s1578_s3] sm:$0xff] %vm674_vm0, %v669_v26  ;;  %v626_v28 = vadd.f32 %v625_v27, %v603_v25 }
 0x119   :  { %v648_v29 = vpop.f32.mrf.mxu2 }
 0x11a   :  { %v649_v30 = vadd.f32 %v648_v29, %v626_v28 }
 0x11b   :  { %v671_v31 = vpop.f32.mrf.mxu3 }
 0x11c   :  { %v672_v32 = vadd.f32 %v671_v31, %v649_v30 }
 0x11e   :  { %676 = vst.msk [vmem:[%s1578_s3 + $0x8] sm:$0xff] %vm674_vm0, %v672_v32 }

</bundles_post_ra>
